<compile_context>
chip_gen: v6e
topology: v6e:2x2x1
jax: 0.10.0
libtpu: 0.0.40
codegen_flags: <defaults>
</compile_context>

<pallas_src>
import math

import jax
import jax.numpy as jnp
from jax.experimental import pallas as pl
from jax.experimental.pallas import tpu as pltpu

_LANE = 128
_SUBLANE = 8
_MIB = 1024 * 1024


def _round_down(value: int, multiple: int) -> int:
    return (value // multiple) * multiple


def _vmem_budget_bytes() -> int:
    """Target cap for the double-buffered VMEM working set, per TPU generation."""
    vmem = None
    try:
        info = pltpu.get_tpu_info()
        vmem = getattr(info, "vmem_capacity_bytes", None)
    except Exception:
        vmem = None
    if not vmem:
        vmem = 64 * _MIB          # conservative fallback: assume v7x-sized VMEM
    if vmem >= 128 * _MIB:        # v5e / v6e: 128 MiB physical
        return 96 * _MIB
    return 48 * _MIB              # v7x: 64 MiB physical -> keep pipelining headroom


def _working_set_bytes(tm, tn, dim, dim2, act_b, w_b, out_b):
    k = dim + dim2
    acts = 2 * tm * k * act_b     # skip + x row tiles, double-buffered
    wts = 2 * k * tn * w_b        # both weight halves, double-buffered
    outs = 2 * tm * tn * out_b    # output tile, double-buffered
    return acts + wts + outs


def _choose_tiles(m, dim, dim2, act_b, w_b, out_b, tm_req, tn_req, budget):
    """Pick (tm, tn) so the double-buffered working set fits the VMEM budget."""
    k = dim + dim2
    budget_eff = int(budget * 0.9)

    # ---- N (output-feature / weight-column) tile ----
    if dim % _LANE != 0:
        tn = dim                                    # can't tile a non-128-multiple lane dim
    elif tn_req is not None:
        tn = min(dim, max(_LANE, _round_down(tn_req, _LANE)))
    else:
        resident_w = 2 * k * dim * w_b              # whole weight, double-buffered
        if resident_w <= budget_eff // 3:
            tn = dim                                # keep the weight resident; DMA'd once
        else:
            # 256-aligned stream fills the 2x256 MXU on v6e/v7x (fine on v5e too).
            tn = min(dim, 512 if dim % 512 == 0 else 256)

    # ---- M (row) tile ----
    tm = tm_req if tm_req is not None else 2048
    tm = min(tm, m)
    if tm < m:
        tm = max(_SUBLANE, _round_down(tm, _SUBLANE))
    while tm > _SUBLANE and _working_set_bytes(
            tm, tn, dim, dim2, act_b, w_b, out_b) > budget_eff:
        tm = max(_SUBLANE, _round_down(tm // 2, _SUBLANE))
    while (dim % _LANE == 0 and tn > _LANE and _working_set_bytes(
            tm, tn, dim, dim2, act_b, w_b, out_b) > budget_eff):
        tn = max(_LANE, _round_down(tn // 2, _LANE))

    # ---- megacore: make sure a parallel axis has >= 2 steps (v7x has 2 TCs) ----
    if m >= 2 * _SUBLANE and pl.cdiv(m, tm) == 1 and pl.cdiv(dim, tn) == 1:
        tm = max(_SUBLANE, _round_down((m + 1) // 2, _SUBLANE))

    return tm, tn


def prepare_concat_combine_weight(weight, dim2=None):
    """Split the PyTorch-layout nn.Linear weight (dim, dim + dim2) into the two
    canonical [K, N] halves the kernel consumes. Call ONCE at model init: the
    transpose is a one-time HBM relayout, not a per-call cost.

    Returns:
      w_skip: (dim2, dim) -- contracted against `skip`
      w_x:    (dim,  dim) -- contracted against `x`
    """
    dim = weight.shape[0]
    if dim2 is None:
        dim2 = weight.shape[1] - dim
    if weight.shape != (dim, dim + dim2):
        raise ValueError(
            f"weight must have shape ({dim}, {dim + dim2}); got {weight.shape}")
    w_skip = jnp.transpose(weight[:, :dim2])    # (dim2, dim)
    w_x = jnp.transpose(weight[:, dim2:])       # (dim,  dim)
    return w_skip, w_x


def _concat_combine_kernel(skip_ref, x_ref, ws_ref, wx_ref, o_ref):
    """One (tm x tn) output tile: canonical [M,K]x[K,N] matmuls, f32 accumulate."""
    acc = jnp.dot(skip_ref[...], ws_ref[...], preferred_element_type=jnp.float32)
    acc = acc + jnp.dot(x_ref[...], wx_ref[...], preferred_element_type=jnp.float32)
    o_ref[...] = acc.astype(o_ref.dtype)


def concat_combine(x, skip, w_skip, w_x, *, tm=None, tn=None,
                   weight_buffers=None, vmem_limit_bytes=None):
    """y = cat([skip, x], -1) @ W.T, with W pre-split/transposed once by
    prepare_concat_combine_weight (ConcatCombine.forward).

    Args:
      x:       (..., dim)
      skip:    (..., dim2)
      w_skip:  (dim2, dim)  canonical [K, N] weight half for `skip`
      w_x:     (dim,  dim)  canonical [K, N] weight half for `x`
      tm, tn:  optional row / output-feature tile overrides (None = auto,
               sized against a generation-aware VMEM budget).
      weight_buffers: optional pl.Buffered depth for the weight BlockSpecs
               (1 when the weight is grid-invariant, 3 on v6e if the streamed
               weight DMA is exposed). Default None = compiler default.
      vmem_limit_bytes: optional scoped-VMEM override.
    """
    dim = x.shape[-1]
    dim2 = skip.shape[-1]
    lead = x.shape[:-1]
    if skip.shape[:-1] != lead:
        raise ValueError("x and skip must share leading dims")
    if w_skip.shape != (dim2, dim) or w_x.shape != (dim, dim):
        raise ValueError(
            f"expected w_skip ({dim2},{dim}) and w_x ({dim},{dim}); "
            f"got {w_skip.shape}, {w_x.shape}")

    m = int(math.prod(lead)) if lead else 1
    x2 = x.reshape(m, dim)
    skip2 = skip.reshape(m, dim2)

    act_b = jnp.dtype(x.dtype).itemsize
    w_b = jnp.dtype(w_x.dtype).itemsize
    out_b = act_b
    budget = _vmem_budget_bytes()
    tm, tn = _choose_tiles(m, dim, dim2, act_b, w_b, out_b, tm, tn, budget)

    grid_m = pl.cdiv(m, tm)
    grid_n = pl.cdiv(dim, tn)
    k = dim + dim2

    # Grid-order selection: rows-outer re-streams the weight grid_m times (unless
    # the weight block index never changes); columns-outer re-streams activations
    # grid_n times. Pick whichever wastes fewer HBM bytes.
    w_bytes = k * dim * w_b
    a_bytes = m * k * act_b
    extra_rows_outer = 0 if grid_n == 1 else w_bytes * (grid_m - 1)
    extra_cols_outer = 0 if grid_m == 1 else a_bytes * (grid_n - 1)
    rows_outer = extra_rows_outer <= extra_cols_outer

    if rows_outer:
        grid = (grid_m, grid_n)
        act_map = lambda i, j: (i, 0)
        w_map = lambda i, j: (0, j)
        out_map = lambda i, j: (i, j)
    else:
        grid = (grid_n, grid_m)
        act_map = lambda j, i: (i, 0)
        w_map = lambda j, i: (0, j)
        out_map = lambda j, i: (i, j)

    w_kwargs = {}
    if weight_buffers is not None:
        w_kwargs["pipeline_mode"] = pl.Buffered(weight_buffers)

    params = dict(dimension_semantics=("parallel", "parallel"))
    if vmem_limit_bytes is None:
        need = int(_working_set_bytes(tm, tn, dim, dim2, act_b, w_b, out_b) * 1.25) + 2 * _MIB
        if need > 16 * _MIB:       # may exceed the smallest default scoped limit (v5e)
            vmem_limit_bytes = min(budget, max(need, 32 * _MIB))
    if vmem_limit_bytes is not None:
        params["vmem_limit_bytes"] = int(vmem_limit_bytes)

    out = pl.pallas_call(
        _concat_combine_kernel,
        out_shape=jax.ShapeDtypeStruct((m, dim), x.dtype),
        grid_spec=pltpu.PrefetchScalarGridSpec(
            num_scalar_prefetch=0,
            grid=grid,
            in_specs=[
                pl.BlockSpec((tm, dim2), act_map),        # skip rows
                pl.BlockSpec((tm, dim), act_map),         # x rows
                pl.BlockSpec((dim2, tn), w_map, **w_kwargs),  # [K,N] weight half (skip)
                pl.BlockSpec((dim, tn), w_map, **w_kwargs),   # [K,N] weight half (x)
            ],
            out_specs=pl.BlockSpec((tm, tn), out_map),
        ),
        compiler_params=pltpu.CompilerParams(**params),
    )(skip2, x2, w_skip, w_x)

    return out.reshape(lead + (dim,))


def concat_combine_torch_layout(x, skip, weight, **kwargs):
    """Convenience path taking the untransposed PyTorch (dim, dim+dim2) weight.
    Prefer prepare_concat_combine_weight once at init + concat_combine per call."""
    w_skip, w_x = prepare_concat_combine_weight(weight, dim2=skip.shape[-1])
    return concat_combine(x, skip, w_skip, w_x, **kwargs)


if __name__ == "__main__":
    # Small, lane-dense shapes: batch=2, seq=8, dim=dim2=128.
    batch, seq, dim, dim2 = 2, 8, 128, 128
    key = jax.random.PRNGKey(0)
    kx, ks, kw, kx2, ks2, kx3, ks3, kw3 = jax.random.split(key, 8)

    x = jax.random.normal(kx, (batch, seq, dim), dtype=jnp.float32)
    skip = jax.random.normal(ks, (batch, seq, dim2), dtype=jnp.float32)
    bound = 1.0 / math.sqrt(dim + dim2)   # nn.Linear default init range
    weight = jax.random.uniform(kw, (dim, dim + dim2), dtype=jnp.float32,
                                minval=-bound, maxval=bound)

    def reference(x_, skip_, w_):
        return jnp.concatenate([skip_, x_], axis=-1) @ w_.T

    # One-time weight preparation (the "model init" step).
    w_skip_t, w_x_t = prepare_concat_combine_weight(weight)

    # float32 path.
    y = jax.block_until_ready(concat_combine(x, skip, w_skip_t, w_x_t))
    ref = reference(x, skip, weight)
    assert y.shape == (batch, seq, dim)
    assert jnp.allclose(y, ref, atol=1e-4, rtol=1e-4), "f32 mismatch vs reference"

    # bfloat16 path (memory-bound op: halves HBM bytes; accumulation stays f32).
    x_bf = x.astype(jnp.bfloat16)
    skip_bf = skip.astype(jnp.bfloat16)
    ws_bf = w_skip_t.astype(jnp.bfloat16)
    wx_bf = w_x_t.astype(jnp.bfloat16)
    y_bf = jax.block_until_ready(concat_combine(x_bf, skip_bf, ws_bf, wx_bf))
    ref_bf = reference(x_bf.astype(jnp.float32), skip_bf.astype(jnp.float32),
                       weight.astype(jnp.bfloat16).astype(jnp.float32))
    assert y_bf.dtype == jnp.bfloat16
    assert jnp.allclose(y_bf.astype(jnp.float32), ref_bf, atol=1e-2, rtol=1e-2), \
        "bf16 mismatch vs reference"

    # Ragged batch*seq (15 rows): exercises the partial last M tile.
    xr = jax.random.normal(kx2, (3, 5, dim), dtype=jnp.float32)
    skipr = jax.random.normal(ks2, (3, 5, dim2), dtype=jnp.float32)
    yr = jax.block_until_ready(concat_combine(xr, skipr, w_skip_t, w_x_t))
    refr = reference(xr, skipr, weight)
    assert yr.shape == (3, 5, dim)
    assert jnp.allclose(yr, refr, atol=1e-4, rtol=1e-4), "ragged-M mismatch vs reference"

    # Asymmetric dims + forced N tiling / small row tile: exercises the streamed
    # weight path and the grid-order selection (columns-outer order here).
    dim_b, dim2_b, m_b = 256, 128, 64
    xb = jax.random.normal(kx3, (m_b, dim_b), dtype=jnp.float32)
    skipb = jax.random.normal(ks3, (m_b, dim2_b), dtype=jnp.float32)
    wb = jax.random.uniform(kw3, (dim_b, dim_b + dim2_b), dtype=jnp.float32,
                            minval=-bound, maxval=bound)
    ws_b, wx_b = prepare_concat_combine_weight(wb)
    yb = jax.block_until_ready(concat_combine(xb, skipb, ws_b, wx_b, tm=32, tn=128))
    refb = reference(xb, skipb, wb)
    assert jnp.allclose(yb, refb, atol=1e-4, rtol=1e-4), "tiled-N mismatch vs reference"

    print("KERNEL_OK")
</pallas_src>

<mosaic_0001>
module attributes {stable_mosaic.version = 11 : i64} {
  func.func @_concat_combine_kernel(%arg0: i32, %arg1: i32, %arg2: memref<8x128xf32, #tpu.memory_space<vmem>>, %arg3: memref<8x128xf32, #tpu.memory_space<vmem>>, %arg4: memref<128x128xf32, #tpu.memory_space<vmem>>, %arg5: memref<128x128xf32, #tpu.memory_space<vmem>>, %arg6: memref<8x128xf32, #tpu.memory_space<vmem>>) attributes {dimension_semantics = [#tpu.dimension_semantics<parallel>, #tpu.dimension_semantics<parallel>], iteration_bounds = array<i64: 2, 1>, scalar_prefetch = 0 : i64, scratch_operands = 0 : i64, tpu.core_type = #tpu.core_type<tc>, window_params = [{transform_indices = @transform_0, window_bounds = array<i64: 8, 128>}, {transform_indices = @transform_1, window_bounds = array<i64: 8, 128>}, {transform_indices = @transform_2, window_bounds = array<i64: 128, 128>}, {transform_indices = @transform_3, window_bounds = array<i64: 128, 128>}, {transform_indices = @transform_4, window_bounds = array<i64: 8, 128>}]} {
    %c0 = arith.constant 0 : index
    %c0_0 = arith.constant 0 : index
    %0 = vector.load %arg2[%c0, %c0_0] : memref<8x128xf32, #tpu.memory_space<vmem>>, vector<8x128xf32>
    %c0_1 = arith.constant 0 : index
    %c0_2 = arith.constant 0 : index
    %1 = vector.load %arg4[%c0_1, %c0_2] : memref<128x128xf32, #tpu.memory_space<vmem>>, vector<128x128xf32>
    %cst = arith.constant dense<0.000000e+00> : vector<8x128xf32>
    %2 = tpu.matmul %0, %1, %cst {dimension_numbers = #tpu.dot_dimension_numbers<[1], [0], [0], [1], [0, 0, 1, 1], [], []>} : vector<8x128xf32>, vector<128x128xf32>, vector<8x128xf32> -> vector<8x128xf32>
    %c0_3 = arith.constant 0 : index
    %c0_4 = arith.constant 0 : index
    %3 = vector.load %arg3[%c0_3, %c0_4] : memref<8x128xf32, #tpu.memory_space<vmem>>, vector<8x128xf32>
    %c0_5 = arith.constant 0 : index
    %c0_6 = arith.constant 0 : index
    %4 = vector.load %arg5[%c0_5, %c0_6] : memref<128x128xf32, #tpu.memory_space<vmem>>, vector<128x128xf32>
    %cst_7 = arith.constant dense<0.000000e+00> : vector<8x128xf32>
    %5 = tpu.matmul %3, %4, %cst_7 {dimension_numbers = #tpu.dot_dimension_numbers<[1], [0], [0], [1], [0, 0, 1, 1], [], []>} : vector<8x128xf32>, vector<128x128xf32>, vector<8x128xf32> -> vector<8x128xf32>
    %6 = arith.addf %2, %5 : vector<8x128xf32>
    %c0_8 = arith.constant 0 : index
    %c0_9 = arith.constant 0 : index
    %7 = vector.load %arg6[%c0_8, %c0_9] : memref<8x128xf32, #tpu.memory_space<vmem>>, vector<8x128xf32>
    tpu.vector_store %arg6[%c0_8, %c0_9], %6 {strides = array<i32>} : memref<8x128xf32, #tpu.memory_space<vmem>>, vector<8x128xf32>,
    return
  }
  func.func @transform_0(%arg0: i32, %arg1: i32) -> (i32, i32) {
    %c0_i32 = arith.constant 0 : i32
    %c0_i32_0 = arith.constant 0 : i32
    return %arg0, %c0_i32 : i32, i32
  }
  func.func @transform_1(%arg0: i32, %arg1: i32) -> (i32, i32) {
    %c0_i32 = arith.constant 0 : i32
    %c0_i32_0 = arith.constant 0 : i32
    return %arg0, %c0_i32 : i32, i32
  }
  func.func @transform_2(%arg0: i32, %arg1: i32) -> (i32, i32) {
    %c0_i32 = arith.constant 0 : i32
    %c0_i32_0 = arith.constant 0 : i32
    return %c0_i32, %arg1 : i32, i32
  }
  func.func @transform_3(%arg0: i32, %arg1: i32) -> (i32, i32) {
    %c0_i32 = arith.constant 0 : i32
    %c0_i32_0 = arith.constant 0 : i32
    return %c0_i32, %arg1 : i32, i32
  }
  func.func @transform_4(%arg0: i32, %arg1: i32) -> (i32, i32) {
    %c0_i32 = arith.constant 0 : i32
    return %arg0, %arg1 : i32, i32
  }
}

</mosaic_0001>

<bundles_post_ra>
// kernel: tpu_custom_call.1
= control target key start
LH: loop header
LB: loop body
LE: loop exit
PB: predicated region body
PF: predicated region fallthrough
CT: control target
= control target key end

     0   :  { %s1323_s0 = inlined_call_operand.hbm [shape: f32[16,128], index: 0, kind: input, shape index: {}]   ;;  %s1324_s1 = inlined_call_operand.hbm [shape: f32[16,128], index: 1, kind: input, shape index: {}]   ;;  %s1325_s2 = inlined_call_operand.hbm [shape: f32[128,128], index: 2, kind: input, shape index: {}]   ;;  %s1326_s3 = inlined_call_operand.hbm [shape: f32[128,128], index: 3, kind: input, shape index: {}]   ;;  %s1327_s4 = inlined_call_operand.hbm [shape: f32[16,128], index: 4, kind: output, shape index: {}]  }
   0x1   :  { %1329 = sst [smem:[#allocation16_spill]] %s1323_s0 }
   0x2   :  { %1330 = sst [smem:[#allocation17_spill]] %s1324_s1 }
   0x3   :  { %9 = vsyncpa [#allocation3], 0 }
   0x4   :  { %11 = vsyncpa [#allocation3 + $0x1], 0 }
   0x5   :  { %12 = vsyncpa [#allocation6], 0 }
   0x6   :  { %14 = vsyncpa [#allocation6 + $0x1], 0 }
   0x7   :  { %15 = vsyncpa [#allocation9], 0 }
   0x8   :  { %16 = vsyncpa [#allocation4], 0 }
   0x9   :  { %18 = vsyncpa [#allocation4 + $0x1], 0  ;;  %s1074_s15 = smov 0   ;;  %s1076_s16 = smov 0  }
   0xa   :  { %s1078_s17 = smov 0   ;;  %s1080_s18 = smov 0  }
   0xb   :  { %s1082_s19 = smov 0   ;;  %s1084_s20 = smov 0  }
   0xc LB: > { %s1105_s21 = sadd.s32 4294967295, %s1038_s20   ;;  %s623_s22 = sadd.s32 4294967294, %s1038_s20   ;;  %s1038_s20 = sphi %s1084_s20, %s24_s20   ;;  %s1034_s19 = sphi %s1082_s19, %s1350_s19   ;;  %s1030_s18 = sphi %s1080_s18, %s1349_s18   ;;  %s1026_s17 = sphi %s1078_s17, %s1348_s17   ;;  %s1022_s16 = sphi %s1076_s16, %s1347_s16   ;;  %s1018_s15 = sphi %s1074_s15, %s1346_s15  }
   0xd   : > { %p56_p0 = scmp.ne.s32.totalorder %s1022_s16, %s1018_s15  ;;  %p1328_p1 = scmp.eq.s32.totalorder %s1105_s21, 0 }
   0xe   : > { %p166_p3 = scmp.eq.s32.totalorder %s623_s22, 1  ;;  %p624_p5 = scmp.ge.s32.totalorder %s1038_s20, 1 }
   0xf   : > { %p1114_p4 = por %p1328_p1, %p56_p0  ;;  %p173_p7 = scmp.lt.s32.totalorder %s1038_s20, 3 }
  0x10   : > { %p1119_p6 = por %p166_p3, %p56_p0  ;;  %s1040_s26 = smov [#allocation7]  }
  0x11   : > { %p1124_p8 = pnand %p624_p5, %p173_p7  ;;  %s187_s27 = sshll.u32 %s1040_s26, 4  ;;  %s188_s27 = int_to_ptr.vmem [resolvable:$true] %s187_s27 }
  0x12   : > { %s1332_s24 = scalar_select %p1119_p6, 1, 0 }
  0x13   : > { %p760_p9 = pneg %p1124_p8  ;;  %s1041_s29 = smov [#allocation8]  }
  0x14   : > { %s202_s30 = sshll.u32 %s1041_s29, 4  ;;  %s849_s5 = scalar_lea.vmem %s188_s27, 2048  ;;  %s203_s30 = int_to_ptr.vmem [resolvable:$true] %s202_s30 }
  0x15   : > { %p1133_p11 = pnand %p760_p9, %p1328_p1  ;;  %p850_p13 = scmp.ne.s32.totalorder %s188_s27, %s849_s5 }
  0x16   : > { %p857_p5 = scmp.lt.s32.totalorder %s188_s27, %s188_s27  ;;  %p858_p7 = scmp.lt.s32.totalorder %s849_s5, %s849_s5 }
  0x17   : > { %p840_p12 = pneg %p1133_p11 }
  0x18   : > { %p859_p10 = por %p858_p7, %p857_p5 }
  0x19   : > { %p852_p0 = pnand %p850_p13, %p840_p12 }
  0x1b   : > { %p853_p3 = pneg %p852_p0 }
  0x1d   : > { %p860_p9 = pnand %p859_p10, %p853_p3 }
  0x1f   : > { %863 = shalt.err (!%p860_p9)
}
  0x20   : > { %s1042_s6 = smov 128   ;;  %s1043_s7 = smov 8  }
  0x21   : > { %763 = dma.hbm_to_vmem [thread:$0]  (!%p1133_p11), %s1325_s2, 2048, %s188_s27, [#allocation6], %s1042_s6, %s1042_s6, %s1043_s7  }
  0x22   : > { %s875_s10 = scalar_lea.vmem %s203_s30, 2048  ;;  %p883_p2 = scmp.lt.s32.totalorder %s203_s30, %s203_s30 }
  0x23   : > { %p876_p1 = scmp.ne.s32.totalorder %s203_s30, %s875_s10  ;;  %p884_p6 = scmp.lt.s32.totalorder %s875_s10, %s875_s10 }
  0x25   : > { %p878_p13 = pnand %p876_p1, %p840_p12  ;;  %p885_p5 = por %p884_p6, %p883_p2 }
  0x27   : > { %p879_p0 = pneg %p878_p13 }
  0x29   : > { %p886_p10 = pnand %p885_p5, %p879_p0 }
  0x2b   : > { %889 = shalt.err (!%p886_p10)
}
  0x2c   : > { %766 = dma.hbm_to_vmem [thread:$0]  (!%p1133_p11), %s1326_s3, 2048, %s203_s30, [#allocation9], %s1042_s6, %s1042_s6, %s1043_s7  }
  0x2d   : > { %s36_s13 = sadd.s32 1, %s1034_s19  ;;  %s43_s14 = sadd.s32 1, %s1026_s17 }
  0x2e   : > { %p38_p1 = scmp.ge.s32.totalorder %s36_s13, 2  ;;  %p50_p2 = scmp.ne.s32.totalorder %s1026_s17, %s1022_s16 }
  0x2f   : > { %p51_p6 = scmp.eq.s32.totalorder %s1038_s20, 0  ;;  %p780_p12 = scmp.lt.s32.totalorder %s1038_s20, 2 }
  0x30   : > { %s1352_s13 = smov (%p38_p1, %s36_s13), 0  ;;  %p1335_p7 = scmp.eq.s32.totalorder %s1105_s21, 1 }
  0x31   : > { %p52_p3 = por %p51_p6, %p50_p2  ;;  %s40_s26 = ssub.s32 %s1034_s19, %s1352_s13 }
  0x32   : > { %p1165_p9 = por %p1335_p7, %p50_p2  ;;  %s216_s27 = sand.u32 1, %s1026_s17  }
  0x33   : > { %p41_p13 = scmp.eq.s32.totalorder %s40_s26, 0  ;;  %s628_s28 = sshll.u32 %s216_s27, 3 }
  0x34   : > { %s629_s29 = sshll.u32 %s1034_s19, 7  ;;  %s1337_s0 = sld [smem:[#allocation16_spill]] }
  0x35   : > { %s1174_s30 = scalar_select %p41_p13, %s1026_s17, %s43_s14  }
  0x36   : > { %s220_s8 = scalar_lea.vmem [#allocation2], %s628_s28  ;;  %p1181_p11 = pnand %p780_p12, %p52_p3 }
  0x37   : > { %s227_s9 = sshll.u32 %s220_s8, 4  ;;  %s1339_s1 = sld [smem:[#allocation17_spill]]  ;;  %s228_s9 = int_to_ptr.vmem [resolvable:$true] %s227_s9 }
  0x38   : > { %s217_s14 = scalar_lea.sflag [#allocation3], %s216_s27  ;;  %p892_p0 = pneg %p1181_p11 }
  0x39   : > { %s903_s5 = scalar_lea.vmem %s228_s9, 128  ;;  %s1044_s6 = smov [#allocation2]  }
  0x3a   : > { %s225_s7 = scalar_lea.hbm %s1337_s0, %s629_s29  ;;  %p904_p5 = scmp.ne.s32.totalorder %s228_s9, %s903_s5 }
  0x3b   : > { %s908_s8 = sshll.u32 %s1044_s6, 4  ;;  %s909_s8 = int_to_ptr.vmem [resolvable:$false] %s908_s8 }
  0x3c   : > { %p906_p10 = pnand %p904_p5, %p892_p0  ;;  %s910_s0 = scalar_lea.vmem %s909_s8, 256 }
  0x3d   : > { %s1188_s26 = scalar_lea.hbm %s1339_s1, %s629_s29  ;;  %p911_p2 = scmp.lt.s32.totalorder %s228_s9, %s909_s8 }
  0x3e   : > { %p907_p1 = pneg %p906_p10  ;;  %p912_p6 = scmp.lt.s32.totalorder %s910_s0, %s903_s5 }
  0x40   : > { %p913_p12 = por %p912_p6, %p911_p2 }
  0x42   : > { %p914_p3 = pnand %p913_p12, %p907_p1 }
  0x44   : > { %917 = shalt.err (!%p914_p3)
}
  0x45   : > { %770 = dma.hbm_to_vmem [thread:$0]  (!%p1181_p11), %s225_s7, 128, %s228_s9, %s217_s14  }
  0x46   : > { %s234_s27 = sand.u32 1, %s1038_s20   ;;  %s238_s29 = scalar_lea.vmem [#allocation5], %s628_s28 }
  0x47   : > { %s245_s11 = sshll.u32 %s238_s29, 4  ;;  %s235_s12 = scalar_lea.sflag [#allocation6], %s234_s27  ;;  %s246_s11 = int_to_ptr.vmem [resolvable:$true] %s245_s11 }
  0x48   : > { %s931_s1 = scalar_lea.vmem %s246_s11, 128  ;;  %s1045_s0 = smov [#allocation5]  }
  0x49   : > { %p932_p7 = scmp.ne.s32.totalorder %s246_s11, %s931_s1  ;;  %s936_s5 = sshll.u32 %s1045_s0, 4  ;;  %s937_s5 = int_to_ptr.vmem [resolvable:$false] %s936_s5 }
  0x4a   : > { %s938_s6 = scalar_lea.vmem %s937_s5, 256  ;;  %p939_p10 = scmp.lt.s32.totalorder %s246_s11, %s937_s5 }
  0x4b   : > { %p934_p13 = pnand %p932_p7, %p892_p0  ;;  %p940_p1 = scmp.lt.s32.totalorder %s938_s6, %s931_s1 }
  0x4d   : > { %p935_p5 = pneg %p934_p13  ;;  %p941_p2 = por %p940_p1, %p939_p10 }
  0x4f   : > { %p942_p6 = pnand %p941_p2, %p935_p5 }
  0x51   : > { %945 = shalt.err (!%p942_p6)
}
  0x52   : > { %773 = dma.hbm_to_vmem [thread:$0]  (!%p1181_p11), %s1188_s26, 128, %s246_s11, %s235_s12  }
  0x53   : > { %254 = sbr.rel (%p1124_p8) target bundleno = 340 (0x154), region = 36  ;;  %s1207_s28 = sand.u32 (!%p1124_p8), 1, %s1022_s16  }
  0x54   : > { %s1210_s7 = sshll.u32 (!%p1124_p8), %s1207_s28, 3  ;;  %s257_s1 = scalar_lea.sflag (!%p1124_p8), [#allocation3], %s1207_s28 }
  0x55   : > { %s260_s9 = scalar_lea.vmem (!%p1124_p8), [#allocation2], %s1210_s7 }
  0x58   : > { %997 = dma.done.wait (%p1114_p4), %s257_s1, 128  }
  0x59   : > { %999 = vsyncadd (%p1114_p4), %s257_s1, 4294967168  ;;  %s265_s25 = sand.u32 1, %s1105_s21   ;;  %s269_s26 = scalar_lea.vmem [#allocation5], %s1210_s7 }
  0x5a   : > { %s266_s10 = scalar_lea.sflag [#allocation6], %s265_s25 }
  0x5b   : > { %1001 = dma.done.wait (%p1114_p4), %s266_s10, 128  }
  0x5c   : > { %1003 = vsyncadd (%p1114_p4), %s266_s10, 4294967168  ;;  %p1340_p8 = scmp.eq.s32.totalorder %s1105_s21, 0 }
  0x5e   : > { %1005 = dma.done.wait (%p1340_p8), [#allocation6], 2048   ;;  %p1341_p11 = pmov %p1340_p8 }
  0x5f   : > { %p1342_p0 = pmov %p1340_p8 }
  0x60   : > { %1007 = vsyncadd (%p1341_p11), [#allocation6], 4294965248 }
  0x61   : > { %1009 = dma.done.wait (%p1342_p0), [#allocation9], 2048   ;;  %p1343_p12 = pmov %p1342_p0 }
  0x62   : > { %v1046_v0 = vmov 0.0   ;;  %vm1047_vm0 = vmmov 0   ;;  %v340_v1 = vld [vmem:[#allocation8 + $0x78] sm:$0xff]  ;;  %v339_v3 = vld [vmem:[#allocation8 + $0x70] sm:$0xff]  ;;  %v338_v5 = vld [vmem:[#allocation8 + $0x68] sm:$0xff]  ;;  %s639_s21 = sshll.u32 %s1030_s18, 7 }
  0x63   : > { %1011 = vsyncadd (%p1343_p12), [#allocation9], 4294965248  ;;  %676 = vmatprep.subr.mxu0 %v1046_v0  ;;  %711 = vmatprep.subr.mxu1 %v1046_v0  ;;  %v323_v2 = vld [vmem:[#allocation7 + $0x78] sm:$0xff]  ;;  %v322_v4 = vld [vmem:[#allocation7 + $0x70] sm:$0xff]  ;;  %s306_s23 = scalar_lea.vmem [#allocation10], %s1210_s7  ;;  %s1275_s29 = scalar_lea.hbm %s1327_s4, %s639_s21 }
  0x64   : > { %708 = vmatprep.mubr.msk.f32.mxu0 %vm1047_vm0, %v1046_v0  ;;  %743 = vmatprep.mubr.msk.f32.mxu1 %vm1047_vm0, %v1046_v0  ;;  %v321_v6 = vld [vmem:[#allocation7 + $0x68] sm:$0xff]  ;;  %v337_v7 = vld [vmem:[#allocation8 + $0x60] sm:$0xff]  ;;  %v336_v9 = vld [vmem:[#allocation8 + $0x58] sm:$0xff]  ;;  %s497_s14 = sshll.u32 %s306_s23, 4  ;;  %s483_s11 = scalar_lea.sflag [#allocation4], %s1207_s28  ;;  %s1277_s14 = int_to_ptr.vmem [resolvable:$true] %s497_s14 }
  0x65   : > { %677 = vmatpush3.msra.mxu0 %v340_v1  ;;  %712 = vmatpush3.msra.mxu1 %v323_v2  ;;  %v320_v8 = vld [vmem:[#allocation7 + $0x60] sm:$0xff]  ;;  %v319_v10 = vld [vmem:[#allocation7 + $0x58] sm:$0xff]  ;;  %v335_v11 = vld [vmem:[#allocation8 + $0x50] sm:$0xff]  ;;  %s946_s18 = scalar_lea.vmem %s1277_s14, 128  ;;  %s1048_s12 = smov [#allocation10]  }
  0x66   : > { %678 = vmatprep.subr.mxu0 %v1046_v0  ;;  %713 = vmatprep.subr.mxu1 %v1046_v0  ;;  %v318_v12 = vld [vmem:[#allocation7 + $0x50] sm:$0xff]  ;;  %v334_v13 = vld [vmem:[#allocation8 + $0x48] sm:$0xff]  ;;  %v333_v15 = vld [vmem:[#allocation8 + $0x40] sm:$0xff]  ;;  %p947_p4 = scmp.ne.s32.totalorder %s1277_s14, %s946_s18  ;;  %s950_s0 = sshll.u32 %s1048_s12, 4  ;;  %s951_s0 = int_to_ptr.vmem [resolvable:$false] %s950_s0 }
  0x67   : > { %679 = vmatpush3.msra.mxu0 %v339_v3  ;;  %714 = vmatpush3.msra.mxu1 %v322_v4  ;;  %v317_v14 = vld [vmem:[#allocation7 + $0x48] sm:$0xff]  ;;  %v316_v16 = vld [vmem:[#allocation7 + $0x40] sm:$0xff]  ;;  %v332_v17 = vld [vmem:[#allocation8 + $0x38] sm:$0xff]  ;;  %s952_s5 = scalar_lea.vmem %s951_s0, 256  ;;  %p953_p13 = scmp.lt.s32.totalorder %s1277_s14, %s951_s0 }
  0x68   : > { %680 = vmatprep.subr.mxu0 %v1046_v0  ;;  %715 = vmatprep.subr.mxu1 %v1046_v0  ;;  %v315_v18 = vld [vmem:[#allocation7 + $0x38] sm:$0xff]  ;;  %v331_v19 = vld [vmem:[#allocation8 + $0x30] sm:$0xff]  ;;  %v330_v21 = vld [vmem:[#allocation8 + $0x28] sm:$0xff]  ;;  %p948_p3 = pnand %p947_p4, %p1165_p9  ;;  %p954_p5 = scmp.lt.s32.totalorder %s952_s5, %s946_s18 }
  0x69   : > { %681 = vmatpush3.msra.mxu0 %v338_v5  ;;  %716 = vmatpush3.msra.mxu1 %v321_v6  ;;  %v314_v20 = vld [vmem:[#allocation7 + $0x30] sm:$0xff]  ;;  %v313_v22 = vld [vmem:[#allocation7 + $0x28] sm:$0xff]  ;;  %v329_v23 = vld [vmem:[#allocation8 + $0x20] sm:$0xff] }
  0x6a   : > { %682 = vmatprep.subr.mxu0 %v1046_v0  ;;  %717 = vmatprep.subr.mxu1 %v1046_v0  ;;  %v312_v24 = vld [vmem:[#allocation7 + $0x20] sm:$0xff]  ;;  %v328_v25 = vld [vmem:[#allocation8 + $0x18] sm:$0xff]  ;;  %v327_v27 = vld [vmem:[#allocation8 + $0x10] sm:$0xff]  ;;  %p949_p7 = pneg %p948_p3  ;;  %p955_p10 = por %p954_p5, %p953_p13 }
  0x6b   : > { %683 = vmatpush3.msra.mxu0 %v337_v7  ;;  %718 = vmatpush3.msra.mxu1 %v320_v8  ;;  %v311_v26 = vld [vmem:[#allocation7 + $0x18] sm:$0xff]  ;;  %v310_v28 = vld [vmem:[#allocation7 + $0x10] sm:$0xff]  ;;  %v326_v29 = vld [vmem:[#allocation8 + $0x8] sm:$0xff] }
  0x6c   : > { %684 = vmatprep.subr.mxu0 %v1046_v0  ;;  %719 = vmatprep.subr.mxu1 %v1046_v0  ;;  %v309_v30 = vld [vmem:[#allocation7 + $0x8] sm:$0xff]  ;;  %v325_v31 = vld [vmem:[#allocation8] sm:$0xff]  ;;  %v324_v33 = vld [vmem:[%s269_s26] sm:$0xff]  ;;  %p956_p1 = pnand %p955_p10, %p949_p7 }
  0x6d   : > { %685 = vmatpush3.msra.mxu0 %v336_v9  ;;  %720 = vmatpush3.msra.mxu1 %v319_v10  ;;  %v308_v32 = vld [vmem:[#allocation7] sm:$0xff] }
  0x6e   : > { %686 = vmatprep.subr.mxu0 %v1046_v0  ;;  %721 = vmatprep.subr.mxu1 %v1046_v0  ;;  %v307_v34 = vld [vmem:[%s260_s9] sm:$0xff] }
  0x6f   : > { %687 = vmatpush3.msra.mxu0 %v335_v11  ;;  %722 = vmatpush3.msra.mxu1 %v318_v12 }
  0x70   : > { %688 = vmatprep.subr.mxu0 %v1046_v0  ;;  %723 = vmatprep.subr.mxu1 %v1046_v0 }
  0x71   : > { %689 = vmatpush3.msra.mxu0 %v334_v13  ;;  %724 = vmatpush3.msra.mxu1 %v317_v14 }
  0x72   : > { %690 = vmatprep.subr.mxu0 %v1046_v0  ;;  %725 = vmatprep.subr.mxu1 %v1046_v0 }
  0x73   : > { %691 = vmatpush3.msra.mxu0 %v333_v15  ;;  %726 = vmatpush3.msra.mxu1 %v316_v16 }
  0x74   : > { %692 = vmatprep.subr.mxu0 %v1046_v0  ;;  %727 = vmatprep.subr.mxu1 %v1046_v0 }
  0x75   : > { %693 = vmatpush3.msra.mxu0 %v332_v17  ;;  %728 = vmatpush3.msra.mxu1 %v315_v18 }
  0x76   : > { %694 = vmatprep.subr.mxu0 %v1046_v0  ;;  %729 = vmatprep.subr.mxu1 %v1046_v0 }
  0x77   : > { %695 = vmatpush3.msra.mxu0 %v331_v19  ;;  %730 = vmatpush3.msra.mxu1 %v314_v20 }
  0x78   : > { %696 = vmatprep.subr.mxu0 %v1046_v0  ;;  %731 = vmatprep.subr.mxu1 %v1046_v0 }
  0x79   : > { %697 = vmatpush3.msra.mxu0 %v330_v21  ;;  %732 = vmatpush3.msra.mxu1 %v313_v22 }
  0x7a   : > { %698 = vmatprep.subr.mxu0 %v1046_v0  ;;  %733 = vmatprep.subr.mxu1 %v1046_v0 }
  0x7b   : > { %699 = vmatpush3.msra.mxu0 %v329_v23  ;;  %734 = vmatpush3.msra.mxu1 %v312_v24 }
  0x7c   : > { %700 = vmatprep.subr.mxu0 %v1046_v0  ;;  %735 = vmatprep.subr.mxu1 %v1046_v0 }
  0x7d   : > { %701 = vmatpush3.msra.mxu0 %v328_v25  ;;  %736 = vmatpush3.msra.mxu1 %v311_v26 }
  0x7e   : > { %702 = vmatprep.subr.mxu0 %v1046_v0  ;;  %737 = vmatprep.subr.mxu1 %v1046_v0 }
  0x7f   : > { %703 = vmatpush3.msra.mxu0 %v327_v27  ;;  %738 = vmatpush3.msra.mxu1 %v310_v28 }
  0x80   : > { %704 = vmatprep.subr.mxu0 %v1046_v0  ;;  %739 = vmatprep.subr.mxu1 %v1046_v0 }
  0x81   : > { %705 = vmatpush3.msra.mxu0 %v326_v29  ;;  %740 = vmatpush3.msra.mxu1 %v309_v30 }
  0x82   : > { %706 = vmatprep.subr.mxu0 %v1046_v0  ;;  %741 = vmatprep.subr.mxu1 %v1046_v0 }
  0x83   : > { %707 = vmatpush3.msra.mxu0 %v325_v31  ;;  %742 = vmatpush3.msra.mxu1 %v308_v32 }
  0x84   : > { %709 = vmatmul.mubr.f32.vlgmr.msra.gmra.mxu0 %v324_v33  ;;  %744 = vmatmul.mubr.f32.vlgmr.msra.gmra.mxu1 %v307_v34 }
 0x144   : > { %v407_v35 = vpop.f32.mrf.mxu0  ;;  %v477_v36 = vpop.f32.mrf.mxu1 }
 0x145   : > { %v478_v37 = vadd.f32 %v477_v36, %v407_v35 }
 0x146   : > { %v710_v38 = vpop.f32.mrf.mxu0  ;;  %v745_v39 = vpop.f32.mrf.mxu1 }
 0x147   : > { %481 = vst [vmem:[%s306_s23] sm:$0xff] %v478_v37 }
 0x148   : > { %959 = shalt.err (!%p956_p1)
}
 0x149   : > { %s960_s6 = scalar_lea.hbm %s1275_s29, 128  ;;  %s964_s1 = scalar_lea.hbm %s1327_s4, 256 }
 0x14a   : > { %p961_p2 = scmp.ne.s32.totalorder %s1275_s29, %s960_s6  ;;  %p965_p11 = scmp.lt.s32.totalorder %s1275_s29, %s1327_s4 }
 0x14b   : > { %p966_p0 = scmp.lt.s32.totalorder %s964_s1, %s960_s6 }
 0x14c   : > { %p962_p6 = pnand %p961_p2, %p1165_p9 }
 0x14d   : > { %p967_p12 = por %p966_p0, %p965_p11 }
 0x14e   : > { %p963_p8 = pneg %p962_p6 }
 0x150   : > { %p968_p4 = pnand %p967_p12, %p963_p8 }
 0x152   : > { %971 = shalt.err (!%p968_p4)
}
 0x153   : > { %758 = dma.vmem_to_hbm [thread:$0]  (%p1165_p9), %s1277_s14, 128, %s1275_s29, %s483_s11  }
 0x154 PF: > { %s509_s10 = sand.u32 1, %s1018_s15   ;;  %p1344_p3 = scmp.ne.s32.totalorder %s1332_s24, 0 }
 0x155   : > { %p1345_p7 = scmp.ge.s32.totalorder %s1038_s20, 2  ;;  %s510_s26 = scalar_lea.sflag [#allocation4], %s509_s10 }
 0x157   : > { %p775_p13 = pnand %p1345_p7, %p1344_p3 }
 0x159   : > { %p776_p5 = pneg %p775_p13 }
 0x15b   : > { %1013 = dma.done.wait (%p776_p5), %s510_s26, 128  }
 0x15c   : > { %1015 = vsyncadd (%p776_p5), %s510_s26, 4294967168  ;;  %s24_s20 = sadd.s32 1, %s1038_s20   ;;  %s1346_s15 = smov %s1022_s16 }
 0x15d   : > { %p21_p10 = scmp.ge.s32.totalorder %s24_s20, 4   ;;  %s1347_s16 = smov %s1026_s17 }
 0x15e   : > { %s1348_s17 = smov %s1174_s30  ;;  %s1349_s18 = smov %s1034_s19 }
 0x15f   : > { %s1350_s19 = smov %s1352_s13  ;;  %23 = sbr.rel (!%p21_p10) target bundleno = 12 (0xc), region = 104 }
 0x164   :  { %515 = vsyncpa [#allocation3], 1 }
 0x165   :  { %517 = vsyncpa [#allocation3 + $0x1], 1 }
 0x166   :  { %518 = vsyncpa [#allocation6], 1 }
 0x167   :  { %520 = vsyncpa [#allocation6 + $0x1], 1 }
 0x168   :  { %521 = vsyncpa [#allocation9], 1 }
 0x169   :  { %522 = vsyncpa [#allocation4], 1 }
 0x16a   :  { %524 = vsyncpa [#allocation4 + $0x1], 1 }

</bundles_post_ra>
